<compile_context>
chip_gen: v7x
topology: tpu7x:2x2x1
jax: 0.10.0
libtpu: 0.0.40
codegen_flags: <defaults>
</compile_context>

<pallas_src>
import functools

import jax
import jax.numpy as jnp
from jax.experimental import pallas as pl
from jax.experimental.pallas import tpu as pltpu


def _mlp_kernel(num_layers, x_ref, *rest):
    # rest = (w0, b0, w1, b1, ..., wL, bL, out_ref)
    param_refs = rest[:-1]
    out_ref = rest[-1]

    h = x_ref[...]

    # Hidden layers: Linear + ReLU (statically unrolled).
    for l in range(num_layers):
        w_ref = param_refs[2 * l]
        b_ref = param_refs[2 * l + 1]
        h = jnp.dot(h, w_ref[...], preferred_element_type=jnp.float32)
        h = jnp.maximum(h + b_ref[...], 0.0)

    # Output layer (no activation). Normalization / de-normalization are
    # already folded into the first / last weights+biases on the host.
    w_ref = param_refs[2 * num_layers]
    b_ref = param_refs[2 * num_layers + 1]
    out_ref[...] = jnp.dot(h, w_ref[...], preferred_element_type=jnp.float32) + b_ref[...]


def fold_normalization(params, mean_x, std_x, mean_y, std_y):
    """Fold (x - mean_x)/std_x and y*std_y + mean_y into first/last layers.

    params: list of (W[in, out], b[1, out]) per layer (already transposed from
    the PyTorch (out, in) layout).  The fold is exact in f32:
        W0' = W0 * (1/std_x)[:, None]
        b0' = b0 - (mean_x / std_x) @ W0
        WL' = WL * std_y            (broadcast over output columns)
        bL' = bL * std_y + mean_y
    """
    folded = [(w, b) for (w, b) in params]

    if mean_x is not None:
        inv_std_x = 1.0 / std_x                       # (1, in)
        w0, b0 = folded[0]
        w0f = w0 * inv_std_x.reshape(-1, 1)           # scale rows of W0
        b0f = b0 - (mean_x * inv_std_x) @ w0          # shift bias
        folded[0] = (w0f, b0f)

    if mean_y is not None:
        wl, bl = folded[-1]
        wlf = wl * std_y                              # scale output columns
        blf = bl * std_y + mean_y
        folded[-1] = (wlf, blf)

    return folded


def mlp_forward(x, params, mean_x, std_x, mean_y, std_y, num_layers,
                batch_block=None):
    """x: [batch, in_size]; params: list of (W[in,out], b[1,out]) per layer."""
    batch = x.shape[0]
    out_size = params[-1][0].shape[1]

    folded = fold_normalization(params, mean_x, std_x, mean_y, std_y)

    flat_params = []
    for w, b in folded:
        flat_params.append(w)
        flat_params.append(b)

    tb = batch if batch_block is None else batch_block
    assert batch % tb == 0, "batch must be divisible by batch_block"
    grid = (batch // tb,)

    # Activations tile over the batch axis; weights/biases stay resident
    # (index_map always returns block (0, 0)).
    x_spec = pl.BlockSpec((tb, x.shape[1]), lambda i: (i, 0))
    param_specs = [pl.BlockSpec(a.shape, lambda i: (0, 0)) for a in flat_params]
    out_spec = pl.BlockSpec((tb, out_size), lambda i: (i, 0))

    out = pl.pallas_call(
        functools.partial(_mlp_kernel, num_layers),
        out_shape=jax.ShapeDtypeStruct((batch, out_size), jnp.float32),
        grid=grid,
        in_specs=[x_spec] + param_specs,
        out_specs=out_spec,
        compiler_params=pltpu.CompilerParams(
            dimension_semantics=("parallel",)),
    )(x, *flat_params)

    # PyTorch `x.squeeze()` — glue, done outside the kernel.
    return jnp.squeeze(out)


def init_params(key, in_size, num_layers, hidden_size, out_size):
    """Deterministic init mimicking nn.Linear default (uniform +/- 1/sqrt(fan_in))."""
    sizes = []
    prev = in_size
    for _ in range(num_layers):
        sizes.append((prev, hidden_size))
        prev = hidden_size
    sizes.append((prev, out_size))

    params = []
    for (fan_in, fan_out) in sizes:
        key, kw, kb = jax.random.split(key, 3)
        bound = 1.0 / jnp.sqrt(fan_in)
        # stored directly as (in, out) == transposed PyTorch layout
        w = jax.random.uniform(kw, (fan_in, fan_out), jnp.float32, -bound, bound)
        b = jax.random.uniform(kb, (1, fan_out), jnp.float32, -bound, bound)
        params.append((w, b))
    return params


if __name__ == "__main__":
    # Shapes consistent with the module's forward.  A slightly larger batch
    # with a batch-tiled grid demonstrates the amortized / parallel path.
    batch = 128
    batch_block = 64          # grid=(2,), "parallel" -> shards across TCs on v7x
    in_size = 16
    num_layers = 2
    hidden_size = 32
    out_size = 1

    key = jax.random.PRNGKey(0)
    key, kx, kp = jax.random.split(key, 3)

    x = jax.random.normal(kx, (batch, in_size), jnp.float32)

    # train_mean_X / train_std_X per-feature; train_mean_y / train_std_y per-output.
    mean_x = jnp.linspace(-0.5, 0.5, in_size, dtype=jnp.float32).reshape(1, in_size)
    std_x = jnp.full((1, in_size), 1.25, dtype=jnp.float32)
    mean_y = jnp.full((1, out_size), 0.3, dtype=jnp.float32)
    std_y = jnp.full((1, out_size), 2.0, dtype=jnp.float32)

    params = init_params(kp, in_size, num_layers, hidden_size, out_size)

    out = mlp_forward(x, params, mean_x, std_x, mean_y, std_y, num_layers,
                      batch_block=batch_block)
    out = jax.block_until_ready(out)

    # Pure-JAX reference with the ORIGINAL (un-folded) math.
    h = (x - mean_x) / std_x
    for l in range(num_layers):
        h = jnp.maximum(h @ params[l][0] + params[l][1], 0.0)
    ref = h @ params[-1][0] + params[-1][1]
    ref = jnp.squeeze(ref * std_y + mean_y)

    assert out.shape == ref.shape == (batch,)
    assert jnp.allclose(out, ref, rtol=1e-5, atol=1e-5)

    print("KERNEL_OK")
</pallas_src>

<mosaic_0001>
module attributes {stable_mosaic.version = 11 : i64} {
  func.func @_mlp_kernel(%arg0: i32, %arg1: memref<64x16xf32, #tpu.memory_space<vmem>>, %arg2: memref<16x32xf32, #tpu.memory_space<vmem>>, %arg3: memref<1x32xf32, #tpu.memory_space<vmem>>, %arg4: memref<32x32xf32, #tpu.memory_space<vmem>>, %arg5: memref<1x32xf32, #tpu.memory_space<vmem>>, %arg6: memref<32x1xf32, #tpu.memory_space<vmem>>, %arg7: memref<1x1xf32, #tpu.memory_space<vmem>>, %arg8: memref<64x1xf32, #tpu.memory_space<vmem>>) attributes {dimension_semantics = [#tpu.dimension_semantics<parallel>], iteration_bounds = array<i64: 2>, scalar_prefetch = 0 : i64, scratch_operands = 0 : i64, tpu.core_type = #tpu.core_type<tc>, window_params = [{transform_indices = @transform_0, window_bounds = array<i64: 64, 16>}, {pipeline_mode = #tpu.pipeline_mode<synchronous>, transform_indices = @transform_1, window_bounds = array<i64: 16, 32>}, {pipeline_mode = #tpu.pipeline_mode<synchronous>, transform_indices = @transform_2, window_bounds = array<i64: 1, 32>}, {pipeline_mode = #tpu.pipeline_mode<synchronous>, transform_indices = @transform_3, window_bounds = array<i64: 32, 32>}, {pipeline_mode = #tpu.pipeline_mode<synchronous>, transform_indices = @transform_4, window_bounds = array<i64: 1, 32>}, {pipeline_mode = #tpu.pipeline_mode<synchronous>, transform_indices = @transform_5, window_bounds = array<i64: 32, 1>}, {pipeline_mode = #tpu.pipeline_mode<synchronous>, transform_indices = @transform_6, window_bounds = array<i64: 1, 1>}, {transform_indices = @transform_7, window_bounds = array<i64: 64, 1>}]} {
    %c0 = arith.constant 0 : index
    %c0_0 = arith.constant 0 : index
    %0 = vector.load %arg1[%c0, %c0_0] : memref<64x16xf32, #tpu.memory_space<vmem>>, vector<64x16xf32>
    %c0_1 = arith.constant 0 : index
    %c0_2 = arith.constant 0 : index
    %1 = vector.load %arg2[%c0_1, %c0_2] : memref<16x32xf32, #tpu.memory_space<vmem>>, vector<16x32xf32>
    %cst = arith.constant dense<0.000000e+00> : vector<64x32xf32>
    %2 = tpu.matmul %0, %1, %cst {dimension_numbers = #tpu.dot_dimension_numbers<[1], [0], [0], [1], [0, 0, 1, 1], [], []>} : vector<64x16xf32>, vector<16x32xf32>, vector<64x32xf32> -> vector<64x32xf32>
    %c0_3 = arith.constant 0 : index
    %c0_4 = arith.constant 0 : index
    %3 = vector.load %arg3[%c0_3, %c0_4] : memref<1x32xf32, #tpu.memory_space<vmem>>, vector<1x32xf32>
    %4 = vector.broadcast %3 : vector<1x32xf32> to vector<64x32xf32>
    %5 = arith.addf %2, %4 : vector<64x32xf32>
    %cst_5 = arith.constant 0.000000e+00 : f32
    %6 = vector.broadcast %cst_5 : f32 to vector<64x32xf32>
    %7 = arith.maximumf %5, %6 : vector<64x32xf32>
    %c0_6 = arith.constant 0 : index
    %c0_7 = arith.constant 0 : index
    %8 = vector.load %arg4[%c0_6, %c0_7] : memref<32x32xf32, #tpu.memory_space<vmem>>, vector<32x32xf32>
    %cst_8 = arith.constant dense<0.000000e+00> : vector<64x32xf32>
    %9 = tpu.matmul %7, %8, %cst_8 {dimension_numbers = #tpu.dot_dimension_numbers<[1], [0], [0], [1], [0, 0, 1, 1], [], []>} : vector<64x32xf32>, vector<32x32xf32>, vector<64x32xf32> -> vector<64x32xf32>
    %c0_9 = arith.constant 0 : index
    %c0_10 = arith.constant 0 : index
    %10 = vector.load %arg5[%c0_9, %c0_10] : memref<1x32xf32, #tpu.memory_space<vmem>>, vector<1x32xf32>
    %11 = vector.broadcast %10 : vector<1x32xf32> to vector<64x32xf32>
    %12 = arith.addf %9, %11 : vector<64x32xf32>
    %cst_11 = arith.constant 0.000000e+00 : f32
    %13 = vector.broadcast %cst_11 : f32 to vector<64x32xf32>
    %14 = arith.maximumf %12, %13 : vector<64x32xf32>
    %c0_12 = arith.constant 0 : index
    %c0_13 = arith.constant 0 : index
    %15 = vector.load %arg6[%c0_12, %c0_13] : memref<32x1xf32, #tpu.memory_space<vmem>>, vector<32x1xf32>
    %cst_14 = arith.constant dense<0.000000e+00> : vector<64x1xf32>
    %16 = tpu.matmul %14, %15, %cst_14 {dimension_numbers = #tpu.dot_dimension_numbers<[1], [0], [0], [1], [0, 0, 1, 1], [], []>} : vector<64x32xf32>, vector<32x1xf32>, vector<64x1xf32> -> vector<64x1xf32>
    %c0_15 = arith.constant 0 : index
    %c0_16 = arith.constant 0 : index
    %17 = vector.load %arg7[%c0_15, %c0_16] : memref<1x1xf32, #tpu.memory_space<vmem>>, vector<1x1xf32>
    %18 = vector.broadcast %17 : vector<1x1xf32> to vector<64x1xf32>
    %19 = arith.addf %16, %18 : vector<64x1xf32>
    %c0_17 = arith.constant 0 : index
    %c0_18 = arith.constant 0 : index
    %20 = vector.load %arg8[%c0_17, %c0_18] : memref<64x1xf32, #tpu.memory_space<vmem>>, vector<64x1xf32>
    tpu.vector_store %arg8[%c0_17, %c0_18], %19 {strides = array<i32>} : memref<64x1xf32, #tpu.memory_space<vmem>>, vector<64x1xf32>,
    return
  }
  func.func @transform_0(%arg0: i32) -> (i32, i32) {
    %c0_i32 = arith.constant 0 : i32
    %c0_i32_0 = arith.constant 0 : i32
    return %arg0, %c0_i32 : i32, i32
  }
  func.func @transform_1(%arg0: i32) -> (i32, i32) {
    %c0_i32 = arith.constant 0 : i32
    %c0_i32_0 = arith.constant 0 : i32
    %c0_i32_1 = arith.constant 0 : i32
    return %c0_i32, %c0_i32_0 : i32, i32
  }
  func.func @transform_2(%arg0: i32) -> (i32, i32) {
    %c0_i32 = arith.constant 0 : i32
    %c0_i32_0 = arith.constant 0 : i32
    %c0_i32_1 = arith.constant 0 : i32
    return %c0_i32, %c0_i32_0 : i32, i32
  }
  func.func @transform_3(%arg0: i32) -> (i32, i32) {
    %c0_i32 = arith.constant 0 : i32
    %c0_i32_0 = arith.constant 0 : i32
    %c0_i32_1 = arith.constant 0 : i32
    return %c0_i32, %c0_i32_0 : i32, i32
  }
  func.func @transform_4(%arg0: i32) -> (i32, i32) {
    %c0_i32 = arith.constant 0 : i32
    %c0_i32_0 = arith.constant 0 : i32
    %c0_i32_1 = arith.constant 0 : i32
    return %c0_i32, %c0_i32_0 : i32, i32
  }
  func.func @transform_5(%arg0: i32) -> (i32, i32) {
    %c0_i32 = arith.constant 0 : i32
    %c0_i32_0 = arith.constant 0 : i32
    %c0_i32_1 = arith.constant 0 : i32
    return %c0_i32, %c0_i32_0 : i32, i32
  }
  func.func @transform_6(%arg0: i32) -> (i32, i32) {
    %c0_i32 = arith.constant 0 : i32
    %c0_i32_0 = arith.constant 0 : i32
    %c0_i32_1 = arith.constant 0 : i32
    return %c0_i32, %c0_i32_0 : i32, i32
  }
  func.func @transform_7(%arg0: i32) -> (i32, i32) {
    %c0_i32 = arith.constant 0 : i32
    %c0_i32_0 = arith.constant 0 : i32
    return %arg0, %c0_i32 : i32, i32
  }
}

</mosaic_0001>

<bundles_post_ra>
// kernel: tpu_custom_call.1
= control target key start
LH: loop header
LB: loop body
LE: loop exit
PB: predicated region body
PF: predicated region fallthrough
CT: control target
= control target key end

     0   :  { %s1002_s26 = smov 0   ;;  %s1094_s0 = inlined_call_operand.vmem [shape: f32[128,16], index: 0, kind: input, shape index: {}]   ;;  %s1095_s1 = inlined_call_operand.vmem [shape: f32[16,32], index: 1, kind: input, shape index: {}]   ;;  %s1096_s2 = inlined_call_operand.vmem [shape: f32[1,32], index: 2, kind: input, shape index: {}]   ;;  %s1097_s3 = inlined_call_operand.vmem [shape: f32[32,32], index: 3, kind: input, shape index: {}]   ;;  %s1098_s4 = inlined_call_operand.vmem [shape: f32[1,32], index: 4, kind: input, shape index: {}]   ;;  %s1099_s5 = inlined_call_operand.vmem [shape: f32[32,1], index: 5, kind: input, shape index: {}]   ;;  %s1100_s6 = inlined_call_operand.<no memory space> [shape: f32[1,1], index: 6, kind: input, shape index: {}]   ;;  %s1101_s7 = inlined_call_operand.vmem [shape: f32[128,1], index: 7, kind: output, shape index: {}]  }
   0x1   :  { %v12_v0 = vstv %s1100_s6 }
   0x2   :  { %13 = vst [vmem:[#allocation2] sm:$0x1] %v12_v0 }
   0x3 LB: > { %s793_s27 = sadd.s32 4294967295, %s957_s26   ;;  %p797_p0 = scmp.ge.s32.totalorder %s957_s26, 1  ;;  %s957_s26 = sphi %s1002_s26, %s19_s26  }
   0x4   : > { %p240_p1 = scmp.lt.s32.totalorder %s957_s26, 3 }
   0x6   : > { %p241_p2 = pnand %p797_p0, %p240_p1 }
   0x7   : > { %v292_v1 = vld [vmem:[%s1095_s1] sm:$0xff] (!%p241_p2)  ;;  %v293_v2 = vld [vmem:[%s1095_s1 + $0x8] sm:$0xff] (!%p241_p2)  ;;  %s798_s8 = sshll.u32 (!%p241_p2), %s793_s27, 3  ;;  %vm301_vm0 = vcmask (!%p241_p2), 130048   ;;  %v441_v15 = vld [vmem:[%s1097_s3 + $0x10] sm:$0xff] (!%p241_p2)  ;;  %vm450_vm1 = vcmask (!%p241_p2), 261120  }
   0x8   : > { %244 = sbr.rel (%p241_p2) target bundleno = 684 (0x2ac), region = 48  ;;  %v439_v3 = vld [vmem:[%s1097_s3] sm:$0xff] (!%p241_p2)  ;;  %v921_v4 = vpack.c.bf16 (!%p241_p2), %v293_v2, %v292_v1  ;;  %p273_p3 = scmp.lt.s32.totalorder (!%p241_p2), %s798_s8, 15  ;;  %v440_v5 = vld [vmem:[%s1097_s3 + $0x8] sm:$0xff] (!%p241_p2)  ;;  %v442_v16 = vld [vmem:[%s1097_s3 + $0x18] sm:$0xff] (!%p241_p2)  ;;  %vm728_vm2 = vcmask (!%p241_p2), 7168  }
   0x9   : > { %v925_v6 = vpack.c.bf16 (!%p241_p2), %v440_v5, %v439_v3  ;;  %v929_v17 = vpack.c.bf16 (!%p241_p2), %v442_v16, %v441_v15  ;;  %v588_v18 = vld [vmem:[%s1099_s5] sm:$0xff] (!%p241_p2)  ;;  %v589_v19 = vld [vmem:[%s1099_s5 + $0x8] sm:$0xff] (!%p241_p2)  ;;  %v590_v46 = vld [vmem:[%s1099_s5 + $0x10] sm:$0xff] (!%p241_p2) }
   0xa   : > { %922 = vmatprep.subr.bf16.mxu0 (!%p241_p2), %v921_v4  ;;  %941 = vmatprep.subr.bf16.mxu1 (!%p241_p2), %v921_v4  ;;  %v933_v20 = vpack.c.bf16 (!%p241_p2), %v589_v19, %v588_v18  ;;  %v802_v21 = vld [vmem:[%s1096_s2] ss:$0 sm:$0xff] (!%p241_p2)  ;;  %v591_v47 = vld [vmem:[%s1099_s5 + $0x18] sm:$0xff] (!%p241_p2) }
   0xb   : > { %924 = vmatpush3.bf16.msra.mxu0 (!%p241_p2), %v921_v4  ;;  %942 = vmatpush3.bf16.msra.mxu1 (!%p241_p2), %v921_v4  ;;  %v937_v48 = vpack.c.bf16 (!%p241_p2), %v591_v47, %v590_v46  ;;  %v811_v49 = vld [vmem:[%s1098_s4] ss:$0 sm:$0xff] (!%p241_p2) }
   0xc   : > { %926 = vmatprep.subr.bf16.mxu1 (!%p241_p2), %v925_v6  ;;  %934 = vmatprep.subr.bf16.mxu0 (!%p241_p2), %v933_v20 }
   0xf   : > { %s1103_s8 = smov (!%p273_p3, %s798_s8), 15 }
  0x10   : > { %s799_s13 = sshll.u32 %s1103_s8, 3 }
  0x11   : > { %s276_s16 = scalar_lea.vmem %s1094_s0, %s799_s13  ;;  %s282_s14 = scalar_lea.vmem %s1101_s7, %s799_s13 }
  0x12   : > { %v284_v7 = vld [vmem:[%s276_s16] sm:$0xff]  ;;  %v285_v8 = vld [vmem:[%s276_s16 + $0x8] sm:$0xff]  ;;  %v286_v9 = vld [vmem:[%s276_s16 + $0x10] sm:$0xff] }
  0x13   : > { %869 = vmatprep.mubr.msk.f32.mxu0 %vm301_vm0, %v284_v7  ;;  %v288_v10 = vld [vmem:[%s276_s16 + $0x20] sm:$0xff]  ;;  %v289_v11 = vld [vmem:[%s276_s16 + $0x28] sm:$0xff]  ;;  %v290_v12 = vld [vmem:[%s276_s16 + $0x30] sm:$0xff] }
  0x14   : > { %870 = vmatmul.mubr.msk.f32.vlgmr.msra.gmra.mrb[0].mxu0 %vm301_vm0, %v285_v8  ;;  %875 = vmatprep.mubr.msk.f32.mxu1 %vm301_vm0, %v288_v10  ;;  %v287_v13 = vld [vmem:[%s276_s16 + $0x18] sm:$0xff]  ;;  %v820_v10 = vld [vmem:[#allocation2] ss:$0 sm:$0xff] }
  0x15   : > { %872 = vmatprep.mubr.msk.f32.mxu0 %vm301_vm0, %v286_v9  ;;  %876 = vmatmul.mubr.msk.f32.vlgmr.msra.gmra.mrb[0].mxu1 %vm301_vm0, %v289_v11  ;;  %v291_v14 = vld [vmem:[%s276_s16 + $0x38] sm:$0xff] }
  0x16   : > { %878 = vmatprep.mubr.msk.f32.mxu1 %vm301_vm0, %v290_v12  ;;  %928 = vmatpush3.bf16.msra.mxu1 %v925_v6 }
  0x17   : > { %930 = vmatprep.subr.bf16.mxu1 %v929_v17  ;;  %936 = vmatpush3.bf16.msra.mxu0 %v933_v20 }
  0x18   : > { %873 = vmatmul.mubr.msk.f32.gmra.mrb[2].mxu0 %vm301_vm0, %v287_v13  ;;  %938 = vmatprep.subr.bf16.mxu0 %v937_v48 }
  0x19   : > { %879 = vmatmul.mubr.msk.f32.gmra.mrb[2].mxu1 %vm301_vm0, %v291_v14 }
  0x1a   : > { %932 = vmatpush3.bf16.msra.mxu1 %v929_v17 }
  0x1b   : > { %940 = vmatpush3.bf16.msra.mxu0 %v937_v48 }
  0xe7   : > { %v871_v22 = vpop.f32.mrb[0].mxu0 }
  0xe8   : > { %v398_v23 = vadd.f32 %v871_v22, %v802_v21  ;;  %v392_v24 = vpop.f32.mrb[1].mxu0  ;;  %v877_v25 = vpop.f32.mrb[0].mxu1 }
  0xe9   : > { %v393_v26 = vadd.f32 %v802_v21, %v392_v24  ;;  %v412_v27 = vpop.f32.mrb[1].mxu1  ;;  %v418_v41 = vadd.f32 %v877_v25, %v802_v21 }
  0xea   : > { %v413_v30 = vadd.f32 %v802_v21, %v412_v27  ;;  %v432_v31 = vmax.f32 %v398_v23, 0.0 }
  0xeb   : > { %v431_v28 = vmax.f32 %v393_v26, 0.0  ;;  %v874_v29 = vpop.f32.mrb[2].mxu0  ;;  %v436_v43 = vmax.f32 %v418_v41, 0.0 }
  0xec   : > { %v408_v32 = vadd.f32 %v874_v29, %v802_v21  ;;  %v402_v33 = vpop.f32.mrb[3].mxu0  ;;  %v880_v34 = vpop.f32.mrb[2].mxu1  ;;  %v435_v38 = vmax.f32 %v413_v30, 0.0 }
  0xed   : > { %v403_v35 = vadd.f32 %v802_v21, %v402_v33  ;;  %889 = vmatprep.mubr.msk.f32.mxu1 %vm450_vm1, %v431_v28  ;;  %v422_v36 = vpop.f32.mrb[3].mxu1  ;;  %v428_v44 = vadd.f32 %v880_v34, %v802_v21 }
  0xee   : > { %890 = vmatmul.mubr.msk.f32.vlgmr.msra.gmra.mrb[4].mxu1 %vm450_vm1, %v432_v31  ;;  %v423_v39 = vadd.f32 %v802_v21, %v422_v36  ;;  %v434_v40 = vmax.f32 %v408_v32, 0.0 }
  0xef   : > { %v433_v37 = vmax.f32 %v403_v35, 0.0  ;;  %v438_v45 = vmax.f32 %v428_v44, 0.0 }
  0xf0   : > { %v437_v42 = vmax.f32 %v423_v39, 0.0 }
  0xf1   : > { %892 = vmatprep.mubr.msk.f32.mxu1 %vm450_vm1, %v433_v37 }
  0xf2   : > { %893 = vmatmul.mubr.msk.f32.gmra.mrb[6].mxu1 %vm450_vm1, %v434_v40 }
  0xf3   : > { %895 = vmatprep.mubr.msk.f32.mxu1 %vm450_vm1, %v435_v38 }
  0xf6   : > { %896 = vmatmul.mubr.msk.f32.gmra.mrb[8].mxu1 %vm450_vm1, %v436_v43 }
  0xf7   : > { %898 = vmatprep.mubr.msk.f32.mxu1 %vm450_vm1, %v437_v42 }
  0xfa   : > { %899 = vmatmul.mubr.msk.f32.gmra.mrb[10].mxu1 %vm450_vm1, %v438_v45 }
 0x1c1   : > { %v891_v50 = vpop.f32.mrb[4].mxu1 }
 0x1c2   : > { %v547_v51 = vadd.f32 %v891_v50, %v811_v49  ;;  %v541_v52 = vpop.f32.mrb[5].mxu1 }
 0x1c3   : > { %v542_v53 = vadd.f32 %v811_v49, %v541_v52 }
 0x1c4   : > { %v581_v56 = vmax.f32 %v547_v51, 0.0 }
 0x1c5   : > { %v580_v54 = vmax.f32 %v542_v53, 0.0  ;;  %v894_v55 = vpop.f32.mrb[6].mxu1 }
 0x1c6   : > { %v557_v57 = vadd.f32 %v894_v55, %v811_v49  ;;  %v551_v58 = vpop.f32.mrb[7].mxu1 }
 0x1c7   : > { %v552_v59 = vadd.f32 %v811_v49, %v551_v58  ;;  %909 = vmatprep.mubr.msk.f32.mxu0 %vm450_vm1, %v580_v54 }
 0x1c8   : > { %910 = vmatmul.mubr.msk.f32.vlgmr.msra.gmra.mrb[4].mxu0 %vm450_vm1, %v581_v56  ;;  %v583_v62 = vmax.f32 %v557_v57, 0.0 }
 0x1c9   : > { %v582_v60 = vmax.f32 %v552_v59, 0.0  ;;  %v897_v61 = vpop.f32.mrb[8].mxu1 }
 0x1ca   : > { %v567_v63 = vadd.f32 %v897_v61, %v811_v49  ;;  %v561_v0 = vpop.f32.mrb[9].mxu1 }
 0x1cb   : > { %v562_v1 = vadd.f32 %v811_v49, %v561_v0  ;;  %912 = vmatprep.mubr.msk.f32.mxu0 %vm450_vm1, %v582_v60 }
 0x1cc   : > { %913 = vmatmul.mubr.msk.f32.gmra.mrb[6].mxu0 %vm450_vm1, %v583_v62  ;;  %v585_v4 = vmax.f32 %v567_v63, 0.0 }
 0x1cd   : > { %v584_v2 = vmax.f32 %v562_v1, 0.0  ;;  %v900_v3 = vpop.f32.mrb[10].mxu1 }
 0x1ce   : > { %v577_v5 = vadd.f32 %v900_v3, %v811_v49  ;;  %v571_v6 = vpop.f32.mrb[11].mxu1 }
 0x1cf   : > { %v572_v7 = vadd.f32 %v811_v49, %v571_v6  ;;  %915 = vmatprep.mubr.msk.f32.mxu0 %vm450_vm1, %v584_v2 }
 0x1d0   : > { %916 = vmatmul.mubr.msk.f32.gmra.mrb[8].mxu0 %vm450_vm1, %v585_v4  ;;  %v587_v9 = vmax.f32 %v577_v5, 0.0 }
 0x1d1   : > { %v586_v8 = vmax.f32 %v572_v7, 0.0 }
 0x1d3   : > { %918 = vmatprep.mubr.msk.f32.mxu0 %vm450_vm1, %v586_v8 }
 0x1d4   : > { %919 = vmatmul.mubr.msk.f32.gmra.mrb[10].mxu0 %vm450_vm1, %v587_v9 }
 0x29b   : > { %v911_v11 = vpop.f32.mrb[4].mxu0 }
 0x29c   : > { %v695_v12 = vadd.f32 %v911_v11, %v820_v10  ;;  %v689_v13 = vpop.f32.mrb[5].mxu0 }
 0x29d   : > { %v690_v14 = vadd.f32 %v820_v10, %v689_v13 }
 0x29e   : > { %730 = vst.msk [vmem:[%s282_s14 + $0x8] sm:$0xff] %vm728_vm2, %v695_v12 }
 0x29f   : > { %729 = vst.msk [vmem:[%s282_s14] sm:$0xff] %vm728_vm2, %v690_v14  ;;  %v914_v15 = vpop.f32.mrb[6].mxu0 }
 0x2a0   : > { %v705_v16 = vadd.f32 %v914_v15, %v820_v10  ;;  %v699_v17 = vpop.f32.mrb[7].mxu0 }
 0x2a1   : > { %v700_v18 = vadd.f32 %v820_v10, %v699_v17 }
 0x2a2   : > { %732 = vst.msk [vmem:[%s282_s14 + $0x18] sm:$0xff] %vm728_vm2, %v705_v16 }
 0x2a3   : > { %731 = vst.msk [vmem:[%s282_s14 + $0x10] sm:$0xff] %vm728_vm2, %v700_v18  ;;  %v917_v19 = vpop.f32.mrb[8].mxu0 }
 0x2a4   : > { %v715_v20 = vadd.f32 %v917_v19, %v820_v10  ;;  %v709_v21 = vpop.f32.mrb[9].mxu0 }
 0x2a5   : > { %v710_v22 = vadd.f32 %v820_v10, %v709_v21 }
 0x2a6   : > { %734 = vst.msk [vmem:[%s282_s14 + $0x28] sm:$0xff] %vm728_vm2, %v715_v20 }
 0x2a7   : > { %733 = vst.msk [vmem:[%s282_s14 + $0x20] sm:$0xff] %vm728_vm2, %v710_v22  ;;  %v920_v23 = vpop.f32.mrb[10].mxu0 }
 0x2a8   : > { %v725_v24 = vadd.f32 %v920_v23, %v820_v10  ;;  %v719_v25 = vpop.f32.mrb[11].mxu0 }
 0x2a9   : > { %v720_v26 = vadd.f32 %v820_v10, %v719_v25 }
 0x2aa   : > { %736 = vst.msk [vmem:[%s282_s14 + $0x38] sm:$0xff] %vm728_vm2, %v725_v24 }
 0x2ab   : > { %735 = vst.msk [vmem:[%s282_s14 + $0x30] sm:$0xff] %vm728_vm2, %v720_v26 }
 0x2ac PF: > { %s19_s26 = sadd.s32 1, %s957_s26  }
 0x2ad   : > { %p16_p4 = scmp.ge.s32.totalorder %s19_s26, 4  }
 0x2af   :  { %18 = sbr.rel (!%p16_p4) target bundleno = 3 (0x3), region = 78 }

</bundles_post_ra>
